<compile_context>
chip_gen: v5e
topology: v5e:2x2
jax: 0.10.0
libtpu: 0.0.40
codegen_flags: <defaults>
</compile_context>

<pallas_src>
import functools

import jax
import jax.numpy as jnp
from jax.experimental import pallas as pl
from jax.experimental.pallas import tpu as pltpu


def _encoder_block_kernel(
    mask_ref,                                   # SMEM (B,) int32 per-sample DropPath keep flags
    x_ref,                                      # (1, N, C) f32
    ln1_g_ref, ln1_b_ref,                       # (1, C) f32
    wqkv_ref, bqkv_ref,                         # (C, 3C) bf16, (1, 3C) f32
    wproj_ref, bproj_ref,                       # (C, C) bf16, (1, C) f32
    ln2_g_ref, ln2_b_ref,                       # (1, C) f32
    w1_ref, b1_ref,                             # (C, Hm) bf16, (1, Hm) f32
    w2_ref, b2_ref,                             # (Hm, C) bf16, (1, C) f32
    o_ref,                                      # (1, N, C)
    *, num_heads, head_dim, inv_keep_prob, eps, mlp_chunk):
    b = pl.program_id(0)
    # Per-sample DropPath scale fused into both residual adds.
    dp = mask_ref[b].astype(jnp.float32) * inv_keep_prob

    x = x_ref[0].astype(jnp.float32)            # (N, C)
    n_tok, c_dim = x.shape
    inv_c = 1.0 / c_dim

    def layer_norm(v, g_ref, beta_ref):
        # Single fused reduction pass: sum and sum-of-squares together.
        s1 = jnp.sum(v, axis=-1, keepdims=True)
        s2 = jnp.sum(v * v, axis=-1, keepdims=True)
        mu = s1 * inv_c
        var = s2 * inv_c - mu * mu
        return (v - mu) * jax.lax.rsqrt(var + eps) * g_ref[...] + beta_ref[...]

    # ---------------- attention branch ----------------
    h = layer_norm(x, ln1_g_ref, ln1_b_ref)
    h_bf = h.astype(jnp.bfloat16)
    # One lane-dense (N,C)@(C,3C) matmul; bf16 operands, f32 accumulation.
    qkv = jnp.dot(h_bf, wqkv_ref[...], preferred_element_type=jnp.float32) + bqkv_ref[...]

    inv_sqrt_d = head_dim ** -0.5
    o_heads = []
    for hh in range(num_heads):                 # static lane slices of the fused QKV result
        lo = hh * head_dim
        q_h = qkv[:, lo:lo + head_dim]
        k_h = qkv[:, c_dim + lo:c_dim + lo + head_dim]
        v_h = qkv[:, 2 * c_dim + lo:2 * c_dim + lo + head_dim]
        s = jax.lax.dot_general(q_h.astype(jnp.bfloat16), k_h.astype(jnp.bfloat16),
                                (((1,), (1,)), ((), ())),
                                preferred_element_type=jnp.float32) * inv_sqrt_d
        s = s - jnp.max(s, axis=-1, keepdims=True)
        p = jnp.exp(s)
        row_sum = jnp.sum(p, axis=-1, keepdims=True)
        # Unnormalized p @ v, then a cheap (N, hd) scale by the EUP approx reciprocal.
        o_h = jnp.dot(p.astype(jnp.bfloat16), v_h.astype(jnp.bfloat16),
                      preferred_element_type=jnp.float32)
        o_h = o_h * pl.reciprocal(row_sum, approx=True)
        o_heads.append(o_h)
    o_concat = jnp.concatenate(o_heads, axis=-1)              # (N, C)
    # One K=C output projection against the full (C, C) slab.
    att = jnp.dot(o_concat.astype(jnp.bfloat16), wproj_ref[...],
                  preferred_element_type=jnp.float32) + bproj_ref[...]
    x1 = x + dp * att                           # residual + fused DropPath

    # ---------------- MLP branch (tiled over the hidden dim) ----------------
    h2 = layer_norm(x1, ln2_g_ref, ln2_b_ref)
    h2_bf = h2.astype(jnp.bfloat16)
    hm = w1_ref.shape[1]
    acc = jnp.zeros((n_tok, c_dim), jnp.float32)
    for c0 in range(0, hm, mlp_chunk):          # chunks >= 128 lanes keep the MXU full
        c1 = min(c0 + mlp_chunk, hm)
        m = jnp.dot(h2_bf, w1_ref[:, c0:c1],
                    preferred_element_type=jnp.float32) + b1_ref[:, c0:c1]
        # tanh-approx GELU (TODO above).
        m = 0.5 * m * (1.0 + jnp.tanh(0.7978845608028654 * (m + 0.044715 * m * m * m)))
        acc = acc + jnp.dot(m.astype(jnp.bfloat16), w2_ref[c0:c1, :],
                            preferred_element_type=jnp.float32)
    x2 = x1 + dp * (acc + b2_ref[...])          # residual + fused DropPath

    o_ref[0] = x2.astype(o_ref.dtype)


@functools.partial(jax.jit, static_argnames=("num_heads", "keep_prob", "eps"))
def transformer_encoder_forward(x, dp_mask, params, *, num_heads, keep_prob=1.0, eps=1e-5):
    """x: (B, N, C) f32; dp_mask: (B,) int32 0/1 keep flags; params: dict of weights."""
    B, N, C = x.shape
    hd = C // num_heads
    Hm = params["w1"].shape[1]
    mlp_chunk = min(Hm, 512)

    # Host/XLA-side bf16 casts of the matmul weights (halves resident weight VMEM).
    wqkv = params["wqkv"].astype(jnp.bfloat16)      # (C, 3C) single slab
    wproj = params["wproj"].astype(jnp.bfloat16)    # (C, C)  single slab
    w1 = params["w1"].astype(jnp.bfloat16)
    w2 = params["w2"].astype(jnp.bfloat16)

    kernel = functools.partial(
        _encoder_block_kernel, num_heads=num_heads, head_dim=hd,
        inv_keep_prob=1.0 / keep_prob, eps=eps, mlp_chunk=mlp_chunk)

    def rep(shape):                             # replicated weight operand: single-buffered
        nd = len(shape)
        return pl.BlockSpec(shape, lambda b, m, _nd=nd: (0,) * _nd,
                            pipeline_mode=pl.Buffered(1))

    in_specs = [
        pl.BlockSpec((1, N, C), lambda b, m: (b, 0, 0)),     # x (double-buffered)
        rep((1, C)), rep((1, C)),                            # ln1 gamma/beta
        rep((C, 3 * C)), rep((1, 3 * C)),                    # wqkv, bqkv
        rep((C, C)), rep((1, C)),                            # wproj, bproj
        rep((1, C)), rep((1, C)),                            # ln2 gamma/beta
        rep((C, Hm)), rep((1, Hm)),                          # fc1
        rep((Hm, C)), rep((1, C)),                           # fc2
    ]

    return pl.pallas_call(
        kernel,
        out_shape=jax.ShapeDtypeStruct((B, N, C), x.dtype),
        grid_spec=pltpu.PrefetchScalarGridSpec(
            num_scalar_prefetch=1,
            grid=(B,),
            in_specs=in_specs,
            out_specs=pl.BlockSpec((1, N, C), lambda b, m: (b, 0, 0)),
        ),
        compiler_params=pltpu.CompilerParams(
            dimension_semantics=("parallel",),   # batch elements are independent (megacore)
            vmem_limit_bytes=64 * 1024 * 1024,   # fits v7x 64 MiB/TC; ample on v5e/v6e
        ),
    )(dp_mask, x,
      params["ln1_g"].reshape(1, C), params["ln1_b"].reshape(1, C),
      wqkv, params["bqkv"].reshape(1, 3 * C),
      wproj, params["bproj"].reshape(1, C),
      params["ln2_g"].reshape(1, C), params["ln2_b"].reshape(1, C),
      w1, params["b1"].reshape(1, Hm),
      w2, params["b2"].reshape(1, C))


class TransformerEncoder:
    """JAX/Pallas forward-pass equivalent of the PyTorch TransformerEncoder block."""

    def __init__(self, embed_dim=768, num_heads=12, qkv_bias=False, mlp_ratio=4,
                 drop_rate=0.0, att_drop_rate=0.0, drop_path_rate=0.0, *, key):
        assert embed_dim % num_heads == 0
        self.embed_dim = int(embed_dim)
        self.num_heads = int(num_heads)
        self.mlp_hidden = int(embed_dim * mlp_ratio)
        self.drop_path_rate = float(drop_path_rate)
        self.keep_prob = 1.0 - self.drop_path_rate

        C, Hm = self.embed_dim, self.mlp_hidden
        ks = jax.random.split(key, 8)
        w = lambda k, shape: 0.1 * jax.random.normal(k, shape, jnp.float32)
        self.params = {
            "ln1_g": jnp.ones((C,), jnp.float32),
            "ln1_b": jnp.zeros((C,), jnp.float32),
            "wqkv": w(ks[0], (C, 3 * C)),
            "bqkv": (w(ks[1], (3 * C,)) if qkv_bias else jnp.zeros((3 * C,), jnp.float32)),
            "wproj": w(ks[2], (C, C)),
            "bproj": w(ks[3], (C,)),
            "ln2_g": jnp.ones((C,), jnp.float32),
            "ln2_b": jnp.zeros((C,), jnp.float32),
            "w1": w(ks[4], (C, Hm)),
            "b1": w(ks[5], (Hm,)),
            "w2": w(ks[6], (Hm, C)),
            "b2": w(ks[7], (C,)),
        }

    def __call__(self, x, *, key=None, training=False):
        B = x.shape[0]
        if training and self.drop_path_rate > 0.0:
            u = jax.random.uniform(key, (B,), jnp.float32)
            mask = jnp.floor(self.keep_prob + u).astype(jnp.int32)  # 1 w.p. keep_prob
            keep = self.keep_prob
        else:
            mask = jnp.ones((B,), jnp.int32)
            keep = 1.0
        return transformer_encoder_forward(
            x, mask, self.params, num_heads=self.num_heads, keep_prob=keep)


def transformer_encoder_ref(x, dp_scale, params, *, num_heads, eps=1e-5):
    """Pure-JAX f32 reference mirroring the PyTorch forward (same DropPath scale)."""
    B, N, C = x.shape
    hd = C // num_heads
    hp = jax.lax.Precision.HIGHEST

    def ln(v, g, b):
        mu = jnp.mean(v, axis=-1, keepdims=True)
        var = jnp.mean(jnp.square(v - mu), axis=-1, keepdims=True)
        return (v - mu) * jax.lax.rsqrt(var + eps) * g + b

    def gelu_tanh(v):
        return 0.5 * v * (1.0 + jnp.tanh(0.7978845608028654 * (v + 0.044715 * v ** 3)))

    s = dp_scale[:, None, None]

    h = ln(x, params["ln1_g"], params["ln1_b"])
    qkv = jnp.einsum("bnc,cd->bnd", h, params["wqkv"], precision=hp) + params["bqkv"]
    qkv = qkv.reshape(B, N, 3, num_heads, hd).transpose(2, 0, 3, 1, 4)
    q, k, v = qkv[0], qkv[1], qkv[2]
    att = jnp.einsum("bhqd,bhkd->bhqk", q, k, precision=hp) * hd ** -0.5
    att = jax.nn.softmax(att, axis=-1)
    o = jnp.einsum("bhqk,bhkd->bhqd", att, v, precision=hp)
    o = o.transpose(0, 2, 1, 3).reshape(B, N, C)
    o = jnp.einsum("bnc,cd->bnd", o, params["wproj"], precision=hp) + params["bproj"]
    x = x + s * o

    h2 = ln(x, params["ln2_g"], params["ln2_b"])
    m = jnp.einsum("bnc,ch->bnh", h2, params["w1"], precision=hp) + params["b1"]
    m = gelu_tanh(m)
    m = jnp.einsum("bnh,hc->bnc", m, params["w2"], precision=hp) + params["b2"]
    return x + s * m


if __name__ == "__main__":
    root = jax.random.PRNGKey(0)
    k_param, k_x, k_dp = jax.random.split(root, 3)

    B, N, C, heads = 2, 8, 32, 4
    module = TransformerEncoder(embed_dim=C, num_heads=heads, qkv_bias=False,
                                mlp_ratio=4, drop_path_rate=0.25, key=k_param)
    x = jax.random.normal(k_x, (B, N, C), jnp.float32)

    # Training-mode forward: DropPath scale fused into the residual adds in-kernel.
    out_train = jax.block_until_ready(module(x, key=k_dp, training=True))
    # Eval-mode forward: DropPath is identity.
    out_eval = jax.block_until_ready(module(x, training=False))

    # Pure-JAX f32 references (same math, same DropPath mask).
    u = jax.random.uniform(k_dp, (B,), jnp.float32)
    dp_train = jnp.floor(module.keep_prob + u) / module.keep_prob
    ref_train = transformer_encoder_ref(x, dp_train, module.params, num_heads=heads)
    ref_eval = transformer_encoder_ref(x, jnp.ones((B,), jnp.float32),
                                       module.params, num_heads=heads)

    assert out_train.shape == x.shape and out_train.dtype == x.dtype
    err_t = float(jnp.max(jnp.abs(out_train - ref_train)))
    err_e = float(jnp.max(jnp.abs(out_eval - ref_eval)))
    # Tolerance loosened (vs f32 reference) for bf16 matmul inputs + approx reciprocal,
    # per the performance-review correctness note.
    assert err_t < 5e-2, f"train-mode mismatch: {err_t}"
    assert err_e < 5e-2, f"eval-mode mismatch: {err_e}"
    print("KERNEL_OK")
</pallas_src>

<mosaic_0001>
module attributes {stable_mosaic.version = 11 : i64} {
  func.func @_encoder_block_kernel(%arg0: i32, %arg1: memref<2xi32, #tpu.memory_space<smem>>, %arg2: memref<1x8x32xf32, #tpu.memory_space<vmem>>, %arg3: memref<1x32xf32, #tpu.memory_space<vmem>>, %arg4: memref<1x32xf32, #tpu.memory_space<vmem>>, %arg5: memref<32x96xbf16, #tpu.memory_space<vmem>>, %arg6: memref<1x96xf32, #tpu.memory_space<vmem>>, %arg7: memref<32x32xbf16, #tpu.memory_space<vmem>>, %arg8: memref<1x32xf32, #tpu.memory_space<vmem>>, %arg9: memref<1x32xf32, #tpu.memory_space<vmem>>, %arg10: memref<1x32xf32, #tpu.memory_space<vmem>>, %arg11: memref<32x128xbf16, #tpu.memory_space<vmem>>, %arg12: memref<1x128xf32, #tpu.memory_space<vmem>>, %arg13: memref<128x32xbf16, #tpu.memory_space<vmem>>, %arg14: memref<1x32xf32, #tpu.memory_space<vmem>>, %arg15: memref<1x8x32xf32, #tpu.memory_space<vmem>>) attributes {dimension_semantics = [#tpu.dimension_semantics<parallel>], iteration_bounds = array<i64: 2>, scalar_prefetch = 1 : i64, scratch_operands = 0 : i64, tpu.core_type = #tpu.core_type<tc>, window_params = [{transform_indices = @transform_0, window_bounds = array<i64: 1, 8, 32>}, {pipeline_mode = #tpu.pipeline_mode<synchronous>, transform_indices = @transform_1, window_bounds = array<i64: 1, 32>}, {pipeline_mode = #tpu.pipeline_mode<synchronous>, transform_indices = @transform_2, window_bounds = array<i64: 1, 32>}, {pipeline_mode = #tpu.pipeline_mode<synchronous>, transform_indices = @transform_3, window_bounds = array<i64: 32, 96>}, {pipeline_mode = #tpu.pipeline_mode<synchronous>, transform_indices = @transform_4, window_bounds = array<i64: 1, 96>}, {pipeline_mode = #tpu.pipeline_mode<synchronous>, transform_indices = @transform_5, window_bounds = array<i64: 32, 32>}, {pipeline_mode = #tpu.pipeline_mode<synchronous>, transform_indices = @transform_6, window_bounds = array<i64: 1, 32>}, {pipeline_mode = #tpu.pipeline_mode<synchronous>, transform_indices = @transform_7, window_bounds = array<i64: 1, 32>}, {pipeline_mode = #tpu.pipeline_mode<synchronous>, transform_indices = @transform_8, window_bounds = array<i64: 1, 32>}, {pipeline_mode = #tpu.pipeline_mode<synchronous>, transform_indices = @transform_9, window_bounds = array<i64: 32, 128>}, {pipeline_mode = #tpu.pipeline_mode<synchronous>, transform_indices = @transform_10, window_bounds = array<i64: 1, 128>}, {pipeline_mode = #tpu.pipeline_mode<synchronous>, transform_indices = @transform_11, window_bounds = array<i64: 128, 32>}, {pipeline_mode = #tpu.pipeline_mode<synchronous>, transform_indices = @transform_12, window_bounds = array<i64: 1, 32>}, {transform_indices = @transform_13, window_bounds = array<i64: 1, 8, 32>}]} {
    %0 = arith.index_cast %arg0 : i32 to index
    %1 = memref.load %arg1[%0] : memref<2xi32, #tpu.memory_space<smem>>
    %2 = arith.sitofp %1 : i32 to f32
    %cst = arith.constant 1.33333337 : f32
    %3 = arith.mulf %2, %cst : f32
    %c0 = arith.constant 0 : index
    %c0_0 = arith.constant 0 : index
    %c0_1 = arith.constant 0 : index
    %4 = vector.load %arg2[%c0, %c0_0, %c0_1] : memref<1x8x32xf32, #tpu.memory_space<vmem>>, vector<1x8x32xf32>
    %5 = vector.shape_cast %4 : vector<1x8x32xf32> to vector<8x32xf32>
    %cst_2 = arith.constant dense<0.000000e+00> : vector<8xf32>
    %6 = vector.multi_reduction <add>, %5, %cst_2 [1] : vector<8x32xf32> to vector<8xf32>
    %7 = vector.shape_cast %6 : vector<8xf32> to vector<8x1xf32>
    %8 = arith.mulf %5, %5 : vector<8x32xf32>
    %cst_3 = arith.constant dense<0.000000e+00> : vector<8xf32>
    %9 = vector.multi_reduction <add>, %8, %cst_3 [1] : vector<8x32xf32> to vector<8xf32>
    %10 = vector.shape_cast %9 : vector<8xf32> to vector<8x1xf32>
    %cst_4 = arith.constant 3.125000e-02 : f32
    %11 = vector.broadcast %cst_4 : f32 to vector<8x1xf32>
    %12 = arith.mulf %7, %11 : vector<8x1xf32>
    %cst_5 = arith.constant 3.125000e-02 : f32
    %13 = vector.broadcast %cst_5 : f32 to vector<8x1xf32>
    %14 = arith.mulf %10, %13 : vector<8x1xf32>
    %15 = arith.mulf %12, %12 : vector<8x1xf32>
    %16 = arith.subf %14, %15 : vector<8x1xf32>
    %17 = vector.broadcast %12 : vector<8x1xf32> to vector<8x32xf32>
    %18 = arith.subf %5, %17 : vector<8x32xf32>
    %cst_6 = arith.constant 9.99999974E-6 : f32
    %19 = vector.broadcast %cst_6 : f32 to vector<8x1xf32>
    %20 = arith.addf %16, %19 : vector<8x1xf32>
    %21 = math.rsqrt %20 : vector<8x1xf32>
    %22 = vector.broadcast %21 : vector<8x1xf32> to vector<8x32xf32>
    %23 = arith.mulf %18, %22 : vector<8x32xf32>
    %c0_7 = arith.constant 0 : index
    %c0_8 = arith.constant 0 : index
    %24 = vector.load %arg3[%c0_7, %c0_8] : memref<1x32xf32, #tpu.memory_space<vmem>>, vector<1x32xf32>
    %25 = vector.broadcast %24 : vector<1x32xf32> to vector<8x32xf32>
    %26 = arith.mulf %23, %25 : vector<8x32xf32>
    %c0_9 = arith.constant 0 : index
    %c0_10 = arith.constant 0 : index
    %27 = vector.load %arg4[%c0_9, %c0_10] : memref<1x32xf32, #tpu.memory_space<vmem>>, vector<1x32xf32>
    %28 = vector.broadcast %27 : vector<1x32xf32> to vector<8x32xf32>
    %29 = arith.addf %26, %28 : vector<8x32xf32>
    %30 = arith.truncf %29 : vector<8x32xf32> to vector<8x32xbf16>
    %c0_11 = arith.constant 0 : index
    %c0_12 = arith.constant 0 : index
    %31 = vector.load %arg5[%c0_11, %c0_12] : memref<32x96xbf16, #tpu.memory_space<vmem>>, vector<32x96xbf16>
    %cst_13 = arith.constant dense<0.000000e+00> : vector<8x96xf32>
    %32 = tpu.matmul %30, %31, %cst_13 {dimension_numbers = #tpu.dot_dimension_numbers<[1], [0], [0], [1], [0, 0, 1, 1], [], []>} : vector<8x32xbf16>, vector<32x96xbf16>, vector<8x96xf32> -> vector<8x96xf32>
    %c0_14 = arith.constant 0 : index
    %c0_15 = arith.constant 0 : index
    %33 = vector.load %arg6[%c0_14, %c0_15] : memref<1x96xf32, #tpu.memory_space<vmem>>, vector<1x96xf32>
    %34 = vector.broadcast %33 : vector<1x96xf32> to vector<8x96xf32>
    %35 = arith.addf %32, %34 : vector<8x96xf32>
    %36 = vector.extract_strided_slice %35 {offsets = [0, 0], sizes = [8, 8], strides = [1, 1]} : vector<8x96xf32> to vector<8x8xf32>
    %37 = vector.extract_strided_slice %35 {offsets = [0, 32], sizes = [8, 8], strides = [1, 1]} : vector<8x96xf32> to vector<8x8xf32>
    %38 = vector.extract_strided_slice %35 {offsets = [0, 64], sizes = [8, 8], strides = [1, 1]} : vector<8x96xf32> to vector<8x8xf32>
    %39 = arith.truncf %36 : vector<8x8xf32> to vector<8x8xbf16>
    %40 = arith.truncf %37 : vector<8x8xf32> to vector<8x8xbf16>
    %cst_16 = arith.constant dense<0.000000e+00> : vector<8x8xf32>
    %41 = tpu.matmul %39, %40, %cst_16 {dimension_numbers = #tpu.dot_dimension_numbers<[1], [1], [0], [0], [0, 0, 1, 0], [], []>} : vector<8x8xbf16>, vector<8x8xbf16>, vector<8x8xf32> -> vector<8x8xf32>
    %cst_17 = arith.constant 0.353553385 : f32
    %42 = vector.broadcast %cst_17 : f32 to vector<8x8xf32>
    %43 = arith.mulf %41, %42 : vector<8x8xf32>
    %cst_18 = arith.constant dense<0xFF800000> : vector<8xf32>
    %44 = vector.multi_reduction <maximumf>, %43, %cst_18 [1] : vector<8x8xf32> to vector<8xf32>
    %45 = vector.shape_cast %44 : vector<8xf32> to vector<8x1xf32>
    %46 = vector.broadcast %45 : vector<8x1xf32> to vector<8x8xf32>
    %47 = arith.subf %43, %46 : vector<8x8xf32>
    %48 = math.exp %47 : vector<8x8xf32>
    %cst_19 = arith.constant dense<0.000000e+00> : vector<8xf32>
    %49 = vector.multi_reduction <add>, %48, %cst_19 [1] : vector<8x8xf32> to vector<8xf32>
    %50 = vector.shape_cast %49 : vector<8xf32> to vector<8x1xf32>
    %51 = arith.truncf %48 : vector<8x8xf32> to vector<8x8xbf16>
    %52 = arith.truncf %38 : vector<8x8xf32> to vector<8x8xbf16>
    %cst_20 = arith.constant dense<0.000000e+00> : vector<8x8xf32>
    %53 = tpu.matmul %51, %52, %cst_20 {dimension_numbers = #tpu.dot_dimension_numbers<[1], [0], [0], [1], [0, 0, 1, 1], [], []>} : vector<8x8xbf16>, vector<8x8xbf16>, vector<8x8xf32> -> vector<8x8xf32>
    %54 = tpu.reciprocal %50 {approx = true} : vector<8x1xf32> -> vector<8x1xf32>
    %55 = vector.broadcast %54 : vector<8x1xf32> to vector<8x8xf32>
    %56 = arith.mulf %53, %55 : vector<8x8xf32>
    %57 = vector.extract_strided_slice %35 {offsets = [0, 8], sizes = [8, 8], strides = [1, 1]} : vector<8x96xf32> to vector<8x8xf32>
    %58 = vector.extract_strided_slice %35 {offsets = [0, 40], sizes = [8, 8], strides = [1, 1]} : vector<8x96xf32> to vector<8x8xf32>
    %59 = vector.extract_strided_slice %35 {offsets = [0, 72], sizes = [8, 8], strides = [1, 1]} : vector<8x96xf32> to vector<8x8xf32>
    %60 = arith.truncf %57 : vector<8x8xf32> to vector<8x8xbf16>
    %61 = arith.truncf %58 : vector<8x8xf32> to vector<8x8xbf16>
    %cst_21 = arith.constant dense<0.000000e+00> : vector<8x8xf32>
    %62 = tpu.matmul %60, %61, %cst_21 {dimension_numbers = #tpu.dot_dimension_numbers<[1], [1], [0], [0], [0, 0, 1, 0], [], []>} : vector<8x8xbf16>, vector<8x8xbf16>, vector<8x8xf32> -> vector<8x8xf32>
    %cst_22 = arith.constant 0.353553385 : f32
    %63 = vector.broadcast %cst_22 : f32 to vector<8x8xf32>
    %64 = arith.mulf %62, %63 : vector<8x8xf32>
    %cst_23 = arith.constant dense<0xFF800000> : vector<8xf32>
    %65 = vector.multi_reduction <maximumf>, %64, %cst_23 [1] : vector<8x8xf32> to vector<8xf32>
    %66 = vector.shape_cast %65 : vector<8xf32> to vector<8x1xf32>
    %67 = vector.broadcast %66 : vector<8x1xf32> to vector<8x8xf32>
    %68 = arith.subf %64, %67 : vector<8x8xf32>
    %69 = math.exp %68 : vector<8x8xf32>
    %cst_24 = arith.constant dense<0.000000e+00> : vector<8xf32>
    %70 = vector.multi_reduction <add>, %69, %cst_24 [1] : vector<8x8xf32> to vector<8xf32>
    %71 = vector.shape_cast %70 : vector<8xf32> to vector<8x1xf32>
    %72 = arith.truncf %69 : vector<8x8xf32> to vector<8x8xbf16>
    %73 = arith.truncf %59 : vector<8x8xf32> to vector<8x8xbf16>
    %cst_25 = arith.constant dense<0.000000e+00> : vector<8x8xf32>
    %74 = tpu.matmul %72, %73, %cst_25 {dimension_numbers = #tpu.dot_dimension_numbers<[1], [0], [0], [1], [0, 0, 1, 1], [], []>} : vector<8x8xbf16>, vector<8x8xbf16>, vector<8x8xf32> -> vector<8x8xf32>
    %75 = tpu.reciprocal %71 {approx = true} : vector<8x1xf32> -> vector<8x1xf32>
    %76 = vector.broadcast %75 : vector<8x1xf32> to vector<8x8xf32>
    %77 = arith.mulf %74, %76 : vector<8x8xf32>
    %78 = vector.extract_strided_slice %35 {offsets = [0, 16], sizes = [8, 8], strides = [1, 1]} : vector<8x96xf32> to vector<8x8xf32>
    %79 = vector.extract_strided_slice %35 {offsets = [0, 48], sizes = [8, 8], strides = [1, 1]} : vector<8x96xf32> to vector<8x8xf32>
    %80 = vector.extract_strided_slice %35 {offsets = [0, 80], sizes = [8, 8], strides = [1, 1]} : vector<8x96xf32> to vector<8x8xf32>
    %81 = arith.truncf %78 : vector<8x8xf32> to vector<8x8xbf16>
    %82 = arith.truncf %79 : vector<8x8xf32> to vector<8x8xbf16>
    %cst_26 = arith.constant dense<0.000000e+00> : vector<8x8xf32>
    %83 = tpu.matmul %81, %82, %cst_26 {dimension_numbers = #tpu.dot_dimension_numbers<[1], [1], [0], [0], [0, 0, 1, 0], [], []>} : vector<8x8xbf16>, vector<8x8xbf16>, vector<8x8xf32> -> vector<8x8xf32>
    %cst_27 = arith.constant 0.353553385 : f32
    %84 = vector.broadcast %cst_27 : f32 to vector<8x8xf32>
    %85 = arith.mulf %83, %84 : vector<8x8xf32>
    %cst_28 = arith.constant dense<0xFF800000> : vector<8xf32>
    %86 = vector.multi_reduction <maximumf>, %85, %cst_28 [1] : vector<8x8xf32> to vector<8xf32>
    %87 = vector.shape_cast %86 : vector<8xf32> to vector<8x1xf32>
    %88 = vector.broadcast %87 : vector<8x1xf32> to vector<8x8xf32>
    %89 = arith.subf %85, %88 : vector<8x8xf32>
    %90 = math.exp %89 : vector<8x8xf32>
    %cst_29 = arith.constant dense<0.000000e+00> : vector<8xf32>
    %91 = vector.multi_reduction <add>, %90, %cst_29 [1] : vector<8x8xf32> to vector<8xf32>
    %92 = vector.shape_cast %91 : vector<8xf32> to vector<8x1xf32>
    %93 = arith.truncf %90 : vector<8x8xf32> to vector<8x8xbf16>
    %94 = arith.truncf %80 : vector<8x8xf32> to vector<8x8xbf16>
    %cst_30 = arith.constant dense<0.000000e+00> : vector<8x8xf32>
    %95 = tpu.matmul %93, %94, %cst_30 {dimension_numbers = #tpu.dot_dimension_numbers<[1], [0], [0], [1], [0, 0, 1, 1], [], []>} : vector<8x8xbf16>, vector<8x8xbf16>, vector<8x8xf32> -> vector<8x8xf32>
    %96 = tpu.reciprocal %92 {approx = true} : vector<8x1xf32> -> vector<8x1xf32>
    %97 = vector.broadcast %96 : vector<8x1xf32> to vector<8x8xf32>
    %98 = arith.mulf %95, %97 : vector<8x8xf32>
    %99 = vector.extract_strided_slice %35 {offsets = [0, 24], sizes = [8, 8], strides = [1, 1]} : vector<8x96xf32> to vector<8x8xf32>
    %100 = vector.extract_strided_slice %35 {offsets = [0, 56], sizes = [8, 8], strides = [1, 1]} : vector<8x96xf32> to vector<8x8xf32>
    %101 = vector.extract_strided_slice %35 {offsets = [0, 88], sizes = [8, 8], strides = [1, 1]} : vector<8x96xf32> to vector<8x8xf32>
    %102 = arith.truncf %99 : vector<8x8xf32> to vector<8x8xbf16>
    %103 = arith.truncf %100 : vector<8x8xf32> to vector<8x8xbf16>
    %cst_31 = arith.constant dense<0.000000e+00> : vector<8x8xf32>
    %104 = tpu.matmul %102, %103, %cst_31 {dimension_numbers = #tpu.dot_dimension_numbers<[1], [1], [0], [0], [0, 0, 1, 0], [], []>} : vector<8x8xbf16>, vector<8x8xbf16>, vector<8x8xf32> -> vector<8x8xf32>
    %cst_32 = arith.constant 0.353553385 : f32
    %105 = vector.broadcast %cst_32 : f32 to vector<8x8xf32>
    %106 = arith.mulf %104, %105 : vector<8x8xf32>
    %cst_33 = arith.constant dense<0xFF800000> : vector<8xf32>
    %107 = vector.multi_reduction <maximumf>, %106, %cst_33 [1] : vector<8x8xf32> to vector<8xf32>
    %108 = vector.shape_cast %107 : vector<8xf32> to vector<8x1xf32>
    %109 = vector.broadcast %108 : vector<8x1xf32> to vector<8x8xf32>
    %110 = arith.subf %106, %109 : vector<8x8xf32>
    %111 = math.exp %110 : vector<8x8xf32>
    %cst_34 = arith.constant dense<0.000000e+00> : vector<8xf32>
    %112 = vector.multi_reduction <add>, %111, %cst_34 [1] : vector<8x8xf32> to vector<8xf32>
    %113 = vector.shape_cast %112 : vector<8xf32> to vector<8x1xf32>
    %114 = arith.truncf %111 : vector<8x8xf32> to vector<8x8xbf16>
    %115 = arith.truncf %101 : vector<8x8xf32> to vector<8x8xbf16>
    %cst_35 = arith.constant dense<0.000000e+00> : vector<8x8xf32>
    %116 = tpu.matmul %114, %115, %cst_35 {dimension_numbers = #tpu.dot_dimension_numbers<[1], [0], [0], [1], [0, 0, 1, 1], [], []>} : vector<8x8xbf16>, vector<8x8xbf16>, vector<8x8xf32> -> vector<8x8xf32>
    %117 = tpu.reciprocal %113 {approx = true} : vector<8x1xf32> -> vector<8x1xf32>
    %118 = vector.broadcast %117 : vector<8x1xf32> to vector<8x8xf32>
    %119 = arith.mulf %116, %118 : vector<8x8xf32>
    %120 = tpu.concatenate %56, %77, %98, %119 in 1 : vector<8x8xf32>, vector<8x8xf32>, vector<8x8xf32>, vector<8x8xf32> -> vector<8x32xf32>
    %121 = arith.truncf %120 : vector<8x32xf32> to vector<8x32xbf16>
    %c0_36 = arith.constant 0 : index
    %c0_37 = arith.constant 0 : index
    %122 = vector.load %arg7[%c0_36, %c0_37] : memref<32x32xbf16, #tpu.memory_space<vmem>>, vector<32x32xbf16>
    %cst_38 = arith.constant dense<0.000000e+00> : vector<8x32xf32>
    %123 = tpu.matmul %121, %122, %cst_38 {dimension_numbers = #tpu.dot_dimension_numbers<[1], [0], [0], [1], [0, 0, 1, 1], [], []>} : vector<8x32xbf16>, vector<32x32xbf16>, vector<8x32xf32> -> vector<8x32xf32>
    %c0_39 = arith.constant 0 : index
    %c0_40 = arith.constant 0 : index
    %124 = vector.load %arg8[%c0_39, %c0_40] : memref<1x32xf32, #tpu.memory_space<vmem>>, vector<1x32xf32>
    %125 = vector.broadcast %124 : vector<1x32xf32> to vector<8x32xf32>
    %126 = arith.addf %123, %125 : vector<8x32xf32>
    %127 = vector.broadcast %3 : f32 to vector<8x32xf32>
    %128 = arith.mulf %127, %126 : vector<8x32xf32>
    %129 = arith.addf %5, %128 : vector<8x32xf32>
    %cst_41 = arith.constant dense<0.000000e+00> : vector<8xf32>
    %130 = vector.multi_reduction <add>, %129, %cst_41 [1] : vector<8x32xf32> to vector<8xf32>
    %131 = vector.shape_cast %130 : vector<8xf32> to vector<8x1xf32>
    %132 = arith.mulf %129, %129 : vector<8x32xf32>
    %cst_42 = arith.constant dense<0.000000e+00> : vector<8xf32>
    %133 = vector.multi_reduction <add>, %132, %cst_42 [1] : vector<8x32xf32> to vector<8xf32>
    %134 = vector.shape_cast %133 : vector<8xf32> to vector<8x1xf32>
    %cst_43 = arith.constant 3.125000e-02 : f32
    %135 = vector.broadcast %cst_43 : f32 to vector<8x1xf32>
    %136 = arith.mulf %131, %135 : vector<8x1xf32>
    %cst_44 = arith.constant 3.125000e-02 : f32
    %137 = vector.broadcast %cst_44 : f32 to vector<8x1xf32>
    %138 = arith.mulf %134, %137 : vector<8x1xf32>
    %139 = arith.mulf %136, %136 : vector<8x1xf32>
    %140 = arith.subf %138, %139 : vector<8x1xf32>
    %141 = vector.broadcast %136 : vector<8x1xf32> to vector<8x32xf32>
    %142 = arith.subf %129, %141 : vector<8x32xf32>
    %cst_45 = arith.constant 9.99999974E-6 : f32
    %143 = vector.broadcast %cst_45 : f32 to vector<8x1xf32>
    %144 = arith.addf %140, %143 : vector<8x1xf32>
    %145 = math.rsqrt %144 : vector<8x1xf32>
    %146 = vector.broadcast %145 : vector<8x1xf32> to vector<8x32xf32>
    %147 = arith.mulf %142, %146 : vector<8x32xf32>
    %c0_46 = arith.constant 0 : index
    %c0_47 = arith.constant 0 : index
    %148 = vector.load %arg9[%c0_46, %c0_47] : memref<1x32xf32, #tpu.memory_space<vmem>>, vector<1x32xf32>
    %149 = vector.broadcast %148 : vector<1x32xf32> to vector<8x32xf32>
    %150 = arith.mulf %147, %149 : vector<8x32xf32>
    %c0_48 = arith.constant 0 : index
    %c0_49 = arith.constant 0 : index
    %151 = vector.load %arg10[%c0_48, %c0_49] : memref<1x32xf32, #tpu.memory_space<vmem>>, vector<1x32xf32>
    %152 = vector.broadcast %151 : vector<1x32xf32> to vector<8x32xf32>
    %153 = arith.addf %150, %152 : vector<8x32xf32>
    %154 = arith.truncf %153 : vector<8x32xf32> to vector<8x32xbf16>
    %cst_50 = arith.constant 0.000000e+00 : f32
    %155 = vector.broadcast %cst_50 : f32 to vector<8x32xf32>
    %c0_51 = arith.constant 0 : index
    %c0_52 = arith.constant 0 : index
    %156 = vector.load %arg11[%c0_51, %c0_52] : memref<32x128xbf16, #tpu.memory_space<vmem>>, vector<32x128xbf16>
    %cst_53 = arith.constant dense<0.000000e+00> : vector<8x128xf32>
    %157 = tpu.matmul %154, %156, %cst_53 {dimension_numbers = #tpu.dot_dimension_numbers<[1], [0], [0], [1], [0, 0, 1, 1], [], []>} : vector<8x32xbf16>, vector<32x128xbf16>, vector<8x128xf32> -> vector<8x128xf32>
    %c0_54 = arith.constant 0 : index
    %c0_55 = arith.constant 0 : index
    %158 = vector.load %arg12[%c0_54, %c0_55] : memref<1x128xf32, #tpu.memory_space<vmem>>, vector<1x128xf32>
    %159 = vector.broadcast %158 : vector<1x128xf32> to vector<8x128xf32>
    %160 = arith.addf %157, %159 : vector<8x128xf32>
    %cst_56 = arith.constant 5.000000e-01 : f32
    %161 = vector.broadcast %cst_56 : f32 to vector<8x128xf32>
    %162 = arith.mulf %161, %160 : vector<8x128xf32>
    %cst_57 = arith.constant 4.471500e-02 : f32
    %163 = vector.broadcast %cst_57 : f32 to vector<8x128xf32>
    %164 = arith.mulf %163, %160 : vector<8x128xf32>
    %165 = arith.mulf %164, %160 : vector<8x128xf32>
    %166 = arith.mulf %165, %160 : vector<8x128xf32>
    %167 = arith.addf %160, %166 : vector<8x128xf32>
    %cst_58 = arith.constant 0.797884583 : f32
    %168 = vector.broadcast %cst_58 : f32 to vector<8x128xf32>
    %169 = arith.mulf %168, %167 : vector<8x128xf32>
    %170 = math.tanh %169 : vector<8x128xf32>
    %cst_59 = arith.constant 1.000000e+00 : f32
    %171 = vector.broadcast %cst_59 : f32 to vector<8x128xf32>
    %172 = arith.addf %171, %170 : vector<8x128xf32>
    %173 = arith.mulf %162, %172 : vector<8x128xf32>
    %174 = arith.truncf %173 : vector<8x128xf32> to vector<8x128xbf16>
    %c0_60 = arith.constant 0 : index
    %c0_61 = arith.constant 0 : index
    %175 = vector.load %arg13[%c0_60, %c0_61] : memref<128x32xbf16, #tpu.memory_space<vmem>>, vector<128x32xbf16>
    %cst_62 = arith.constant dense<0.000000e+00> : vector<8x32xf32>
    %176 = tpu.matmul %174, %175, %cst_62 {dimension_numbers = #tpu.dot_dimension_numbers<[1], [0], [0], [1], [0, 0, 1, 1], [], []>} : vector<8x128xbf16>, vector<128x32xbf16>, vector<8x32xf32> -> vector<8x32xf32>
    %177 = arith.addf %155, %176 : vector<8x32xf32>
    %c0_63 = arith.constant 0 : index
    %c0_64 = arith.constant 0 : index
    %178 = vector.load %arg14[%c0_63, %c0_64] : memref<1x32xf32, #tpu.memory_space<vmem>>, vector<1x32xf32>
    %179 = vector.broadcast %178 : vector<1x32xf32> to vector<8x32xf32>
    %180 = arith.addf %177, %179 : vector<8x32xf32>
    %181 = vector.broadcast %3 : f32 to vector<8x32xf32>
    %182 = arith.mulf %181, %180 : vector<8x32xf32>
    %183 = arith.addf %129, %182 : vector<8x32xf32>
    %c0_65 = arith.constant 0 : index
    %c0_66 = arith.constant 0 : index
    %c0_67 = arith.constant 0 : index
    %184 = vector.load %arg15[%c0_65, %c0_66, %c0_67] : memref<1x8x32xf32, #tpu.memory_space<vmem>>, vector<1x8x32xf32>
    %185 = vector.shape_cast %184 : vector<1x8x32xf32> to vector<8x32xf32>
    %186 = vector.shape_cast %183 : vector<8x32xf32> to vector<1x8x32xf32>
    tpu.vector_store %arg15[%c0_65, %c0_66, %c0_67], %186 {strides = array<i32>} : memref<1x8x32xf32, #tpu.memory_space<vmem>>, vector<1x8x32xf32>,
    return
  }
  func.func @transform_0(%arg0: i32, %arg1: memref<2xi32, #tpu.memory_space<smem>>) -> (i32, i32, i32) {
    %c0_i32 = arith.constant 0 : i32
    %c0_i32_0 = arith.constant 0 : i32
    %c0_i32_1 = arith.constant 0 : i32
    return %arg0, %c0_i32, %c0_i32_0 : i32, i32, i32
  }
  func.func @transform_1(%arg0: i32, %arg1: memref<2xi32, #tpu.memory_space<smem>>) -> (i32, i32) {
    %c0_i32 = arith.constant 0 : i32
    %c0_i32_0 = arith.constant 0 : i32
    %c0_i32_1 = arith.constant 0 : i32
    return %c0_i32, %c0_i32_0 : i32, i32
  }
  func.func @transform_2(%arg0: i32, %arg1: memref<2xi32, #tpu.memory_space<smem>>) -> (i32, i32) {
    %c0_i32 = arith.constant 0 : i32
    %c0_i32_0 = arith.constant 0 : i32
    %c0_i32_1 = arith.constant 0 : i32
    return %c0_i32, %c0_i32_0 : i32, i32
  }
  func.func @transform_3(%arg0: i32, %arg1: memref<2xi32, #tpu.memory_space<smem>>) -> (i32, i32) {
    %c0_i32 = arith.constant 0 : i32
    %c0_i32_0 = arith.constant 0 : i32
    %c0_i32_1 = arith.constant 0 : i32
    return %c0_i32, %c0_i32_0 : i32, i32
  }
  func.func @transform_4(%arg0: i32, %arg1: memref<2xi32, #tpu.memory_space<smem>>) -> (i32, i32) {
    %c0_i32 = arith.constant 0 : i32
    %c0_i32_0 = arith.constant 0 : i32
    %c0_i32_1 = arith.constant 0 : i32
    return %c0_i32, %c0_i32_0 : i32, i32
  }
  func.func @transform_5(%arg0: i32, %arg1: memref<2xi32, #tpu.memory_space<smem>>) -> (i32, i32) {
    %c0_i32 = arith.constant 0 : i32
    %c0_i32_0 = arith.constant 0 : i32
    %c0_i32_1 = arith.constant 0 : i32
    return %c0_i32, %c0_i32_0 : i32, i32
  }
  func.func @transform_6(%arg0: i32, %arg1: memref<2xi32, #tpu.memory_space<smem>>) -> (i32, i32) {
    %c0_i32 = arith.constant 0 : i32
    %c0_i32_0 = arith.constant 0 : i32
    %c0_i32_1 = arith.constant 0 : i32
    return %c0_i32, %c0_i32_0 : i32, i32
  }
  func.func @transform_7(%arg0: i32, %arg1: memref<2xi32, #tpu.memory_space<smem>>) -> (i32, i32) {
    %c0_i32 = arith.constant 0 : i32
    %c0_i32_0 = arith.constant 0 : i32
    %c0_i32_1 = arith.constant 0 : i32
    return %c0_i32, %c0_i32_0 : i32, i32
  }
  func.func @transform_8(%arg0: i32, %arg1: memref<2xi32, #tpu.memory_space<smem>>) -> (i32, i32) {
    %c0_i32 = arith.constant 0 : i32
    %c0_i32_0 = arith.constant 0 : i32
    %c0_i32_1 = arith.constant 0 : i32
    return %c0_i32, %c0_i32_0 : i32, i32
  }
  func.func @transform_9(%arg0: i32, %arg1: memref<2xi32, #tpu.memory_space<smem>>) -> (i32, i32) {
    %c0_i32 = arith.constant 0 : i32
    %c0_i32_0 = arith.constant 0 : i32
    %c0_i32_1 = arith.constant 0 : i32
    return %c0_i32, %c0_i32_0 : i32, i32
  }
  func.func @transform_10(%arg0: i32, %arg1: memref<2xi32, #tpu.memory_space<smem>>) -> (i32, i32) {
    %c0_i32 = arith.constant 0 : i32
    %c0_i32_0 = arith.constant 0 : i32
    %c0_i32_1 = arith.constant 0 : i32
    return %c0_i32, %c0_i32_0 : i32, i32
  }
  func.func @transform_11(%arg0: i32, %arg1: memref<2xi32, #tpu.memory_space<smem>>) -> (i32, i32) {
    %c0_i32 = arith.constant 0 : i32
    %c0_i32_0 = arith.constant 0 : i32
    %c0_i32_1 = arith.constant 0 : i32
    return %c0_i32, %c0_i32_0 : i32, i32
  }
  func.func @transform_12(%arg0: i32, %arg1: memref<2xi32, #tpu.memory_space<smem>>) -> (i32, i32) {
    %c0_i32 = arith.constant 0 : i32
    %c0_i32_0 = arith.constant 0 : i32
    %c0_i32_1 = arith.constant 0 : i32
    return %c0_i32, %c0_i32_0 : i32, i32
  }
  func.func @transform_13(%arg0: i32, %arg1: memref<2xi32, #tpu.memory_space<smem>>) -> (i32, i32, i32) {
    %c0_i32 = arith.constant 0 : i32
    %c0_i32_0 = arith.constant 0 : i32
    %c0_i32_1 = arith.constant 0 : i32
    return %arg0, %c0_i32, %c0_i32_0 : i32, i32, i32
  }
}

</mosaic_0001>

<bundles_post_ra>
// kernel: transformer_encoder_forward.1
= control target key start
LH: loop header
LB: loop body
LE: loop exit
PB: predicated region body
PF: predicated region fallthrough
CT: control target
= control target key end

     0   :  { %s1302_s16 = smov [#allocation3]   ;;  %s1615_s0 = inlined_call_operand.vmem [shape: s32[2], index: 0, kind: input, shape index: {}]   ;;  %s1616_s1 = inlined_call_operand.vmem [shape: f32[2,8,32], index: 1, kind: input, shape index: {}]   ;;  %s1617_s2 = inlined_call_operand.vmem [shape: f32[1,32], index: 2, kind: input, shape index: {}]   ;;  %s1618_s3 = inlined_call_operand.vmem [shape: f32[1,32], index: 3, kind: input, shape index: {}]   ;;  %s1619_s4 = inlined_call_operand.vmem [shape: bf16[32,96], index: 4, kind: input, shape index: {}]   ;;  %s1620_s5 = inlined_call_operand.vmem [shape: f32[1,96], index: 5, kind: input, shape index: {}]   ;;  %s1621_s6 = inlined_call_operand.vmem [shape: bf16[32,32], index: 6, kind: input, shape index: {}]   ;;  %s1622_s7 = inlined_call_operand.vmem [shape: f32[1,32], index: 7, kind: input, shape index: {}]   ;;  %s1623_s8 = inlined_call_operand.vmem [shape: f32[1,32], index: 8, kind: input, shape index: {}]   ;;  %s1624_s9 = inlined_call_operand.vmem [shape: f32[1,32], index: 9, kind: input, shape index: {}]   ;;  %s1625_s10 = inlined_call_operand.vmem [shape: bf16[32,128], index: 10, kind: input, shape index: {}]   ;;  %s1626_s11 = inlined_call_operand.vmem [shape: f32[1,128], index: 11, kind: input, shape index: {}]   ;;  %s1627_s12 = inlined_call_operand.vmem [shape: bf16[128,32], index: 12, kind: input, shape index: {}]   ;;  %s1628_s13 = inlined_call_operand.vmem [shape: f32[1,32], index: 13, kind: input, shape index: {}]   ;;  %s1629_s14 = inlined_call_operand.hbm [shape: f32[2,8,32], index: 14, kind: output, shape index: {}]  }
   0x1   :  { %1630 = sst [smem:[#allocation8_spill]] %s1616_s1  ;;  %s20_s15 = sshll.u32 %s1615_s0, 4  ;;  %s21_s15 = int_to_ptr.vmem [resolvable:$true] %s20_s15 }
   0x2   :  { %1631 = sst [smem:[#allocation9_spill]] %s1617_s2 }
   0x3   :  { %1632 = sst [smem:[#allocation10_spill]] %s1618_s3 }
   0x4   :  { %1633 = sst [smem:[#allocation11_spill]] %s1619_s4 }
   0x5   :  { %23 = dma.vmem_to_smem %s21_s15, 16, %s1302_s16, [#allocation2] }
   0x6   :  { %1280 = dma.done.wait [#allocation2], 16 }
   0x7   :  { %1281 = vsyncadd [#allocation2], 4294967280 }
   0x8   :  { %26 = sfence }
   0x9   :  { %27 = vsyncpa [#allocation5], 0 }
   0xa   :  { %29 = vsyncpa [#allocation5 + $0x1], 0  ;;  %s1395_s17 = smov 0   ;;  %s1397_s18 = smov 0  }
   0xb   :  { %s1399_s19 = smov 0   ;;  %s1401_s20 = smov 0  }
   0xc LB: > { %s1416_s0 = sadd.s32 4294967295, %s1300_s20   ;;  %s1049_s21 = sadd.s32 4294967294, %s1300_s20   ;;  %s1300_s20 = sphi %s1401_s20, %s1643_s20   ;;  %s1296_s19 = sphi %s1399_s19, %s1642_s19   ;;  %s1292_s18 = sphi %s1397_s18, %s1641_s18   ;;  %s1288_s17 = sphi %s1395_s17, %s1640_s17  }
   0xd   : > { %s1420_s22 = sadd.s32 1, %s1300_s20   ;;  %s320_s23 = sadd.s32 1, %s1296_s19 }
   0xe   : > { %s317_s24 = ssub.s32 %s1300_s20, %s1420_s22  ;;  %p330_p0 = scmp.ne.s32.totalorder %s1296_s19, %s1292_s18 }
   0xf   : > { %p318_p1 = scmp.eq.s32.totalorder %s317_s24, 0  ;;  %p331_p2 = scmp.eq.s32.totalorder %s1416_s0, 1 }
  0x10   : > { %p336_p3 = scmp.ne.s32.totalorder %s1292_s18, %s1288_s17  ;;  %p337_p4 = scmp.eq.s32.totalorder %s1049_s21, 1 }
  0x11   : > { %s1431_s25 = scalar_select %p318_p1, %s1296_s19, %s320_s23  }
  0x12   : > { %p1433_p5 = por %p331_p2, %p330_p0  ;;  %p1437_p6 = por %p337_p4, %p336_p3 }
  0x13   : > { %p1052_p7 = scmp.ge.s32.totalorder %s1300_s20, 1  ;;  %p398_p8 = scmp.lt.s32.totalorder %s1300_s20, 3 }
  0x15   : > { %p399_p9 = pnand %p1052_p7, %p398_p8 }
  0x16   : > { %p441_p10 = scmp.lt.s32.totalorder (!%p399_p9), %s1416_s0, 1  ;;  %s1636_s1 = sld [smem:[#allocation8_spill]] (!%p399_p9) }
  0x17   : > { %402 = sbr.rel (%p399_p9) target bundleno = 1826 (0x722), region = 72  ;;  %s1637_s4 = sld [smem:[#allocation11_spill]] (!%p399_p9) }
  0x18   : > { %s1638_s2 = sld [smem:[#allocation9_spill]] (!%p399_p9)  ;;  %s1303_s24 = smov (!%p399_p9), 120  }
  0x19   : > { %s1639_s3 = sld [smem:[#allocation10_spill]] (!%p399_p9)  ;;  %s1306_s30 = smov (!%p399_p9), 112  }
  0x1a   : > { %s1307_s15 = smov (!%p399_p9), 88   ;;  %s1309_s21 = smov (!%p399_p9), 72  }
  0x1b   : > { %s1310_s23 = smov (!%p399_p9), 104  }
  0x1c   : > { %s442_s28 = scalar_select %p441_p10, %s1416_s0, 1  ;;  %vm450_vm0 = vcmask 261120   ;;  %v1196_v27 = vld [vmem:[%s1620_s5] ss:$0 sm:$0xff]  ;;  %vm562_vm4 = vcmask 1043456   ;;  %vm526_vm5 = vcmask 64512  }
  0x1d   : > { %v1127_v4 = vld [vmem:[%s1637_s4 + $0x8] sm:$0xff]  ;;  %v1126_v6 = vld [vmem:[%s1637_s4] sm:$0xff]  ;;  %vm765_vm6 = vcmask 130048   ;;  %vm767_vm7 = vcmask 195584  }
  0x1e   : > { %s1054_s29 = sshll.u32 %s442_s28, 3  ;;  %515 = vmatpush.bf16.msra.mxu0 %v1127_v4  ;;  %v1194_v20 = vld [vmem:[%s1638_s2] ss:$0 sm:$0xff]  ;;  %s1304_s28 = smov 64  }
  0x1f   : > { %s444_s16 = scalar_lea.vmem %s1636_s1, %s1054_s29  ;;  %v1195_v23 = vld [vmem:[%s1639_s3] ss:$0 sm:$0xff]  ;;  %s1305_s29 = smov 96  }
  0x20   : > { %v1448_v0 = vld [vmem:[%s444_s16] sm:$0xff]  ;;  %s1308_s16 = smov 56   ;;  %s438_s1 = sand.u32 1, %s1292_s18  }
  0x21   : > { %v451_v1 = vsel %vm450_vm0, %v1448_v0, 0.0  ;;  %v454_v2 = vmul.f32 %v1448_v0, %v1448_v0  ;;  %s1053_s2 = sshll.u32 %s438_s1, 3  ;;  %s1123_s3 = sshll.u32 %s1416_s0, 3 }
  0x22   : > { %452 = vadd.xlane.f32.xlu0 %v451_v1  ;;  %516 = vmatpush.bf16.msra.mxu0 %v1126_v6 }
  0x23   : > { %v455_v3 = vsel %vm450_vm0, %v454_v2, 0.0 }
  0x2a   : > { %456 = vadd.xlane.f32.xlu0 %v455_v3 }
  0x95   : > { %v453_v5 = vpop.xlane.xlu0 %452 }
  0x96   : > { %v458_v7 = vmul.f32 0.03125, %v453_v5 }
  0x98   : > { %v460_v9 = vmul.f32 %v458_v7, %v458_v7  ;;  %v462_v19 = vsub.f32 %v1448_v0, %v458_v7 }
  0x9d   : > { %v457_v8 = vpop.xlane.xlu0 %456 }
  0x9e   : > { %v459_v10 = vmul.f32 0.03125, %v457_v8 }
  0xa0   : > { %v461_v11 = vsub.f32 %v459_v10, %v460_v9 }
  0xa2   : > { %v463_v12 = vadd.f32 1e-05, %v461_v11 }
  0xa4   : > { %1202 = vrsqrt.f32 %v463_v12  ;;  %vm470_vm2 = vweird.f32 %v463_v12 }
  0xaa   : > { %v1203_v13 = vpop.eup %1202 }
  0xab   : > { %v465_v14 = vmul.f32 %v1203_v13, %v463_v12  ;;  %vm471_vm1 = vweird.f32 %v1203_v13 }
  0xac   : > { %vm472_vm3 = vmor %vm470_vm2, %vm471_vm1 }
  0xad   : > { %v466_v15 = vmul.f32 %v1203_v13, %v465_v14 }
  0xaf   : > { %v467_v16 = vmul.f32 0.5, %v466_v15 }
  0xb1   : > { %v468_v17 = vsub.f32 1.5, %v467_v16 }
  0xb3   : > { %v469_v18 = vmul.f32 %v1203_v13, %v468_v17 }
  0xb5   : > { %v473_v21 = vsel %vm472_vm3, %v1203_v13, %v469_v18 }
  0xb6   : > { %v474_v22 = vmul.f32 %v473_v21, %v462_v19 }
  0xb8   : > { %v479_v24 = vmul.f32 %v1194_v20, %v474_v22 }
  0xba   : > { %v484_v25 = vadd.f32 %v1195_v23, %v479_v24 }
  0xbc   : > { %v485_v26 = vpack.c.bf16 %v484_v25, %v484_v25 }
  0xbe   : > { %1063 = vmatmul.msk.bf16.vlgmr.msra.gmra.mxu0 %vm450_vm0, %v485_v26 }
 0x13b   : > { %v518_v28 = vpop.f32.mrf.mxu0 }
 0x13c   : > { %v519_v29 = vadd.f32 %v1196_v27, %v518_v28 }
 0x13e   : > { %v1472_v30 = vpack.c.bf16 %v519_v29, %v519_v29 }
 0x140   : > { %581 = vrot.lane.b32.xlu0 %v1472_v30, %s1303_s24  ;;  %557 = vrot.lane.b32.xlu2 %v1472_v30, %s1304_s28  ;;  %s1311_s24 = smov 80   ;;  %s1312_s28 = smov 40  }
 0x141   : > { %524 = vrot.lane.b32.xlu1 %v1472_v30, %s1305_s29  ;;  %s1313_s29 = smov 48  }
 0x143   : > { %v520_v31 = vpop.f32.mrf.mxu0 }
 0x148   : > { %638 = vrot.lane.b32.xlu0 %v1472_v30, %s1306_s30  ;;  %583 = vrot.lane.b32.xlu2 %v1472_v30, %s1307_s15  ;;  %s1314_s30 = smov 16   ;;  %s1315_s15 = smov 8  }
 0x150   : > { %615 = vrot.lane.b32.xlu0 %v1472_v30, %s1308_s16  ;;  %697 = vrot.lane.b32.xlu2 %v1472_v30, %s1309_s21  ;;  %s1316_s16 = smov 24   ;;  %s985_s21 = scalar_lea.hbm %s1629_s14, %s1123_s3 }
 0x151   : > { %s989_s4 = sshll.u32 %s985_s21, 4  ;;  %s990_s4 = int_to_ptr.hbm [resolvable:$true] %s989_s4 }
 0x158   : > { %695 = vrot.lane.b32.xlu2 %v1472_v30, %s1310_s23  ;;  %s440_s23 = scalar_lea.vmem [#allocation4], %s1053_s2 }
 0x160   : > { %640 = vrot.lane.b32.xlu2 %v1472_v30, %s1311_s24  ;;  %s987_s24 = sshll.u32 %s440_s23, 4  ;;  %s988_s24 = int_to_ptr.vmem [resolvable:$true] %s987_s24 }
 0x19a   : > { %v558_v32 = vpop.permute.xlu2 %557 }
 0x19b   : > { %v564_v33 = vsel %vm562_vm4, %v558_v32, 0 }
 0x19c   : > { %573 = vmatpush.bf16.msra.mxu2 %v564_v33 }
 0x1a2   : > { %v584_v34 = vpop.permute.xlu2 %583 }
 0x1a3   : > { %v589_v35 = vsel %vm526_vm5, %v584_v34, 0 }
 0x1a4   : > { %598 = vmatpush.bf16.xpose.msrb.mxu2 %v589_v35 }
 0x1aa   : > { %v698_v36 = vpop.permute.xlu2 %697 }
 0x1ab   : > { %v703_v37 = vsel %vm526_vm5, %v698_v36, 0 }
 0x1ac   : > { %712 = vmatpush.bf16.xpose.msra.mxu3 %v703_v37 }
 0x1b2   : > { %v696_v38 = vpop.permute.xlu2 %695  ;;  %v582_v41 = vpop.permute.xlu0 %581 }
 0x1b3   : > { %v525_v39 = vpop.permute.xlu1 %524  ;;  %1070 = vmatmul.msk.bf16.vlgmr.msra.gmra.mxu3 %vm526_vm5, %v696_v38 }
 0x1b4   : > { %v531_v40 = vsel %vm526_vm5, %v525_v39, 0 }
 0x1b5   : > { %540 = vmatpush.bf16.xpose.msra.mxu1 %v531_v40 }
 0x1ba   : > { %v641_v42 = vpop.permute.xlu2 %640  ;;  %v639_v44 = vpop.permute.xlu0 %638 }
 0x1bb   : > { %v646_v43 = vsel %vm526_vm5, %v641_v42, 0 }
 0x1bc   : > { %1064 = vmatmul.msk.bf16.vlgmr.msra.gmra.mxu1 %vm526_vm5, %v1472_v30  ;;  %655 = vmatpush.bf16.xpose.msrb.mxu0 %v646_v43 }
 0x1c2   : > { %v616_v57 = vpop.permute.xlu0 %615 }
 0x1c3   : > { %1068 = vmatmul.msk.bf16.vlgmr.msrb.gmra.mxu0 %vm526_vm5, %v639_v44  ;;  %v621_v5 = vsel %vm562_vm4, %v616_v57, 0  ;;  %v1197_v57 = vld [vmem:[%s1622_s7] ss:$0 sm:$0xff] }
 0x236   : > { %v714_v45 = vpop.f32.mrf.mxu3 }
 0x237   : > { %v718_v50 = vmul.f32 0.35355338, %v714_v45  ;;  %v1129_v45 = vld [vmem:[%s1621_s6 + $0x8] sm:$0xff] }
 0x238   : > { %799 = vmatpush.bf16.msra.mxu0 %v1129_v45 }
 0x239   : > { %v542_v46 = vpop.f32.mrf.mxu1  ;;  %v719_v55 = vsel %vm526_vm5, %v718_v50, -inf }
 0x23a   : > { %v546_v47 = vmul.f32 0.35355338, %v542_v46  ;;  %v1128_v46 = vld [vmem:[%s1621_s6] sm:$0xff] }
 0x23c   : > { %v547_v48 = vsel %vm526_vm5, %v546_v47, -inf  ;;  %800 = vmatpush.bf16.msra.mxu0 %v1128_v46 }
 0x23d   : > { %548 = vmax.xlane.f32.xlu1 %v547_v48 }
 0x23e   : > { %v716_v49 = vpop.f32.mrf.mxu3 }
 0x240   : > { %v657_v51 = vpop.f32.mrf.mxu0 }
 0x241   : > { %v544_v52 = vpop.f32.mrf.mxu1  ;;  %v661_v53 = vmul.f32 0.35355338, %v657_v51 }
 0x243   : > { %v662_v54 = vsel %vm526_vm5, %v661_v53, -inf }
 0x244   : > { %663 = vmax.xlane.f32.xlu0 %v662_v54 }
 0x245   : > { %720 = vmax.xlane.f32.xlu1 %v719_v55 }
 0x248   : > { %v659_v56 = vpop.f32.mrf.mxu0 }
 0x25e   : > { %729 = vrot.lane.b32.xlu1 %v1472_v30, %s1312_s28  ;;  %s1250_s28 = sshra.s32 %s990_s4, 4  ;;  %s1251_s28 = int_to_ptr.hbm [resolvable:$true] %s1250_s28 }
 0x25f   : > { %p1257_p0 = scmp.lt.s32.totalorder %s1251_s28, %s1629_s14 }
 0x2b0   : > { %v549_v58 = vpop.xlane.xlu1 %548 }
 0x2b1   : > { %v550_v59 = vsub.f32 %v546_v47, %v549_v58 }
 0x2b3   : > { %v551_v60 = vmul.f32 1.442695, %v550_v59 }
 0x2b5   : > { %1204 = vpow2.f32 %v551_v60 }
 0x2b7   : > { %v664_v61 = vpop.xlane.xlu0 %663 }
 0x2b8   : > { %v665_v62 = vsub.f32 %v661_v53, %v664_v61  ;;  %v721_v63 = vpop.xlane.xlu1 %720 }
 0x2b9   : > { %v722_v2 = vsub.f32 %v718_v50, %v721_v63 }
 0x2ba   : > { %v666_v1 = vmul.f32 1.442695, %v665_v62 }
 0x2bb   : > { %v1205_v3 = vpop.eup %1204  ;;  %v723_v6 = vmul.f32 1.442695, %v722_v2 }
 0x2bc   : > { %1206 = vpow2.f32 %v666_v1  ;;  %v556_v4 = vpack.c.bf16 %v1205_v3, %v1205_v3  ;;  %v553_v19 = vsel %vm526_vm5, %v1205_v3, 0.0 }
 0x2bd   : > { %1208 = vpow2.f32 %v723_v6 }
 0x2be   : > { %1065 = vmatmul.msk.bf16.vlgmr.msra.gmra.mxu2 %vm526_vm5, %v556_v4  ;;  %v1131_v4 = vld [vmem:[%s1625_s10 + $0x8] sm:$0xff] }
 0x2bf   : > { %630 = vmatpush.bf16.msra.mxu2 %v621_v5 }
 0x2c2   : > { %v1207_v7 = vpop.eup %1206 }
 0x2c3   : > { %v668_v8 = vsel %vm526_vm5, %v1207_v7, 0.0  ;;  %v1209_v9 = vpop.eup %1208  ;;  %v671_v26 = vpack.c.bf16 %v1207_v7, %v1207_v7 }
 0x2c4   : > { %669 = vadd.xlane.f32.xlu0 %v668_v8  ;;  %v725_v10 = vsel %vm526_vm5, %v1209_v9, 0.0  ;;  %v728_v29 = vpack.c.bf16 %v1209_v9, %v1209_v9 }
 0x2cc   : > { %726 = vadd.xlane.f32.xlu0 %v725_v10  ;;  %v1139_v10 = vld [vmem:[%s1627_s12 + $0x38] sm:$0xff] }
 0x2cd   : > { %958 = vmatpush.bf16.msrb.mxu3 %v1139_v10 }
 0x2ce   : > { %1066 = vmatmul.msk.bf16.vlgmr.msrb.gmra.mxu2 %vm526_vm5, %v582_v41 }
 0x2d0   : > { %v730_v11 = vpop.permute.xlu1 %729 }
 0x2d1   : > { %v735_v12 = vsel %vm562_vm4, %v730_v11, 0 }
 0x2d2   : > { %744 = vmatpush.bf16.msrb.mxu2 %v735_v12  ;;  %v1138_v12 = vld [vmem:[%s1627_s12 + $0x30] sm:$0xff] }
 0x2d3   : > { %959 = vmatpush.bf16.msrb.mxu3 %v1138_v12 }
 0x341   : > { %v575_v13 = vpop.f32.mrf.mxu2 }
 0x349   : > { %v577_v14 = vpop.f32.mrf.mxu2 }
 0x351   : > { %v600_v15 = vpop.f32.mrf.mxu2 }
 0x352   : > { %v604_v16 = vmul.f32 0.35355338, %v600_v15 }
 0x354   : > { %v605_v17 = vsel %vm526_vm5, %v604_v16, -inf }
 0x355   : > { %606 = vmax.xlane.f32.xlu2 %v605_v17 }
 0x359   : > { %v602_v18 = vpop.f32.mrf.mxu2 }
 0x36d   : > { %672 = vrot.lane.b32.xlu2 %v1472_v30, %s1313_s29  ;;  %v670_v30 = vpop.xlane.xlu0 %669  ;;  %s446_s29 = sld [smem:[#allocation3 + %s1416_s0]]  ;;  %s975_s0 = scalar_lea.sflag [#allocation5], %s438_s1 }
 0x375   : > { %v727_v39 = vpop.xlane.xlu0 %726 }
 0x396   : > { %554 = vadd.xlane.f32.xlu2 %v553_v19 }
 0x3c8   : > { %v607_v20 = vpop.xlane.xlu2 %606 }
 0x3c9   : > { %v608_v21 = vsub.f32 %v604_v16, %v607_v20 }
 0x3cb   : > { %v609_v22 = vmul.f32 1.442695, %v608_v21  ;;  %v1198_v21 = vld [vmem:[%s1623_s8] ss:$0 sm:$0xff] }
 0x3cd   : > { %1210 = vpow2.f32 %v609_v22 }
 0x3ce   : > { %1212 = vrcp.f32 %v670_v30  ;;  %v1135_v30 = vld [vmem:[%s1627_s12 + $0x18] sm:$0xff] }
 0x3d0   : > { %v673_v23 = vpop.permute.xlu2 %672 }
 0x3d1   : > { %v678_v24 = vsel %vm562_vm4, %v673_v23, 0 }
 0x3d2   : > { %687 = vmatpush.bf16.msrb.mxu1 %v678_v24  ;;  %v1199_v24 = vld [vmem:[%s1624_s9] ss:$0 sm:$0xff] }
 0x3d3   : > { %v1211_v25 = vpop.eup %1210 }
 0x3d4   : > { %v614_v27 = vpack.c.bf16 %v1211_v25, %v1211_v25  ;;  %v611_v28 = vsel %vm526_vm5, %v1211_v25, 0.0  ;;  %v1213_v32 = vpop.eup %1212 }
 0x3d5   : > { %612 = vadd.xlane.f32.xlu1 %v611_v28  ;;  %1069 = vmatmul.msk.bf16.vlgmr.msrb.gmra.mxu1 %vm526_vm5, %v671_v26  ;;  %v1137_v28 = vld [vmem:[%s1627_s12 + $0x28] sm:$0xff] }
 0x3d6   : > { %1067 = vmatmul.msk.bf16.vlgmr.msra.gmra.mxu2 %vm526_vm5, %v614_v27  ;;  %873 = vmatpush.bf16.msra.mxu1 %v1131_v4 }
 0x3d7   : > { %960 = vmatpush.bf16.msrb.mxu3 %v1137_v28 }
 0x3e6   : > { %1071 = vmatmul.msk.bf16.vlgmr.msrb.gmra.mxu2 %vm526_vm5, %v728_v29  ;;  %v1136_v29 = vld [vmem:[%s1627_s12 + $0x20] sm:$0xff] }
 0x3e7   : > { %961 = vmatpush.bf16.msrb.mxu3 %v1136_v29 }
 0x3eb   : > { %962 = vmatpush.bf16.msrb.mxu3 %v1135_v30 }
 0x409   : > { %v555_v47 = vpop.xlane.xlu2 %554 }
 0x448   : > { %v613_v31 = vpop.xlane.xlu1 %612 }
 0x449   : > { %1214 = vrcp.f32 %v613_v31  ;;  %v1134_v31 = vld [vmem:[%s1627_s12 + $0x10] sm:$0xff] }
 0x44a   : > { %1216 = vrcp.f32 %v727_v39  ;;  %963 = vmatpush.bf16.msrb.mxu3 %v1134_v31 }
 0x44b   : > { %1218 = vrcp.f32 %v555_v47 }
 0x44f   : > { %v1215_v35 = vpop.eup %1214 }
 0x450   : > { %v1217_v41 = vpop.eup %1216 }
 0x451   : > { %v1219_v48 = vpop.eup %1218 }
 0x452   : > { %v689_v33 = vpop.f32.mrf.mxu1  ;;  %v580_v50 = vmul.f32 %v1219_v48, %v575_v13  ;;  %v1201_v48 = vld [vmem:[%s1628_s13] ss:$0 sm:$0xff] }
 0x453   : > { %v694_v34 = vmul.f32 %v1213_v32, %v689_v33  ;;  %v1133_v32 = vld [vmem:[%s1627_s12 + $0x8] sm:$0xff]  ;;  %v1132_v33 = vld [vmem:[%s1627_s12] sm:$0xff] }
 0x454   : > { %964 = vmatpush.bf16.msrb.mxu3 %v1133_v32 }
 0x455   : > { %757 = vrot.lane.b32.xlu1 %v694_v34, %s1314_s30  ;;  %s447_s30 = scvt.s32.f32 %s446_s29  ;;  %v1200_v34 = vld [vmem:[%s1626_s11] ss:$0 sm:$0xff]  ;;  %s1252_s29 = scalar_lea.hbm %s1251_s28, 8 }
 0x456   : > { %p1253_p11 = scmp.ne.s32.totalorder %s1251_s28, %s1252_s29 }
 0x458   : > { %965 = vmatpush.bf16.msrb.mxu3 %v1132_v33  ;;  %p1254_p12 = pnand %p1253_p11, %p1433_p5 }
 0x459   : > { %v632_v36 = vpop.f32.mrf.mxu2 }
 0x45a   : > { %v637_v37 = vmul.f32 %v1215_v35, %v632_v36  ;;  %v691_v38 = vpop.f32.mrf.mxu1  ;;  %p1255_p13 = pneg %p1254_p12 }
 0x45c   : > { %753 = vrot.lane.b32.xlu0 %v637_v37, %s1315_s15  ;;  %s1519_s15 = smul.f32 1.3333334, %s447_s30 }
 0x45e   : > { %v806_v59 = vstv %s1519_s15  ;;  %s1256_s15 = scalar_lea.hbm %s1629_s14, 16 }
 0x45f   : > { %p1258_p1 = scmp.lt.s32.totalorder %s1256_s15, %s1252_s29 }
 0x461   : > { %v634_v40 = vpop.f32.mrf.mxu2  ;;  %p1259_p2 = por %p1258_p1, %p1257_p0 }
 0x463   : > { %p1260_p3 = pnand %p1259_p2, %p1255_p13 }
 0x469   : > { %v746_v42 = vpop.f32.mrf.mxu2 }
 0x46a   : > { %v751_v43 = vmul.f32 %v1217_v41, %v746_v42 }
 0x46c   : > { %761 = vrot.lane.b32.xlu0 %v751_v43, %s1316_s16 }
 0x471   : > { %v748_v44 = vpop.f32.mrf.mxu2 }
 0x4c7   : > { %v758_v52 = vpop.permute.xlu1 %757 }
 0x4ce   : > { %v754_v49 = vpop.permute.xlu0 %753 }
 0x4cf   : > { %v764_v51 = vsel %vm526_vm5, %v580_v50, %v754_v49 }
 0x4d0   : > { %v766_v54 = vsel %vm765_vm6, %v764_v51, %v758_v52 }
 0x4de   : > { %v762_v53 = vpop.permute.xlu0 %761 }
 0x4df   : > { %v768_v55 = vsel %vm767_vm7, %v766_v54, %v762_v53 }
 0x4e0   : > { %v769_v56 = vpack.c.bf16 %v768_v55, %v768_v55 }
 0x4e2   : > { %1080 = vmatmul.msk.bf16.vlgmr.msra.gmra.mxu0 %vm450_vm0, %v769_v56 }
 0x55f   : > { %v802_v58 = vpop.f32.mrf.mxu0 }
 0x560   : > { %v803_v60 = vadd.f32 %v1197_v57, %v802_v58 }
 0x562   : > { %v807_v61 = vmul.f32 %v806_v59, %v803_v60 }
 0x564   : > { %v1528_v62 = vadd.f32 %v807_v61, %v1448_v0  ;;  %v1130_v0 = vld [vmem:[%s1625_s10] sm:$0xff] }
 0x565   : > { %874 = vmatpush.bf16.msra.mxu1 %v1130_v0 }
 0x566   : > { %v809_v63 = vsel %vm450_vm0, %v1528_v62, 0.0  ;;  %v812_v1 = vmul.f32 %v1528_v62, %v1528_v62 }
 0x567   : > { %v804_v2 = vpop.f32.mrf.mxu0  ;;  %810 = vadd.xlane.f32.xlu0 %v809_v63 }
 0x568   : > { %v813_v3 = vsel %vm450_vm0, %v812_v1, 0.0 }
 0x569   : > { %814 = vadd.xlane.f32.xlu2 %v813_v3 }
 0x5da   : > { %v811_v5 = vpop.xlane.xlu0 %810 }
 0x5db   : > { %v816_v6 = vmul.f32 0.03125, %v811_v5 }
 0x5dc   : > { %v815_v7 = vpop.xlane.xlu2 %814 }
 0x5dd   : > { %v818_v8 = vmul.f32 %v816_v6, %v816_v6  ;;  %v817_v9 = vmul.f32 0.03125, %v815_v7  ;;  %v820_v20 = vsub.f32 %v1528_v62, %v816_v6 }
 0x5df   : > { %v819_v11 = vsub.f32 %v817_v9, %v818_v8 }
 0x5e1   : > { %v821_v13 = vadd.f32 1e-05, %v819_v11 }
 0x5e3   : > { %1220 = vrsqrt.f32 %v821_v13  ;;  %vm828_vm9 = vweird.f32 %v821_v13 }
 0x5e9   : > { %v1221_v14 = vpop.eup %1220 }
 0x5ea   : > { %v823_v15 = vmul.f32 %v1221_v14, %v821_v13  ;;  %vm829_vm8 = vweird.f32 %v1221_v14 }
 0x5eb   : > { %vm830_vm10 = vmor %vm828_vm9, %vm829_vm8 }
 0x5ec   : > { %v824_v16 = vmul.f32 %v1221_v14, %v823_v15 }
 0x5ee   : > { %v825_v17 = vmul.f32 0.5, %v824_v16 }
 0x5f0   : > { %v826_v18 = vsub.f32 1.5, %v825_v17 }
 0x5f2   : > { %v827_v19 = vmul.f32 %v1221_v14, %v826_v18 }
 0x5f4   : > { %v831_v22 = vsel %vm830_vm10, %v1221_v14, %v827_v19 }
 0x5f5   : > { %v832_v23 = vmul.f32 %v831_v22, %v820_v20 }
 0x5f7   : > { %v837_v25 = vmul.f32 %v1198_v21, %v832_v23 }
 0x5f9   : > { %v842_v26 = vadd.f32 %v1199_v24, %v837_v25 }
 0x5fb   : > { %v843_v27 = vpack.c.bf16 %v842_v26, %v842_v26 }
 0x5fd   : > { %1089 = vmatmul.msk.bf16.vlgmr.msra.gmra.mxu1 %vm450_vm0, %v843_v27 }
 0x67a   : > { %v876_v35 = vpop.f32.mrf.mxu1 }
 0x67b   : > { %v877_v36 = vadd.f32 %v1200_v34, %v876_v35 }
 0x67d   : > { %v881_v37 = vmul.f32 0.044715, %v877_v36  ;;  %v880_v44 = vmul.f32 0.5, %v877_v36 }
 0x67f   : > { %v882_v38 = vmul.f32 %v881_v37, %v877_v36 }
 0x681   : > { %v883_v39 = vmul.f32 %v882_v38, %v877_v36 }
 0x682   : > { %v878_v40 = vpop.f32.mrf.mxu1 }
 0x683   : > { %v884_v41 = vadd.f32 %v883_v39, %v877_v36 }
 0x685   : > { %v885_v42 = vmul.f32 0.7978846, %v884_v41 }
 0x687   : > { %1222 = vtanh.f32 %v885_v42 }
 0x68d   : > { %v1223_v43 = vpop.eup %1222 }
 0x68e   : > { %v887_v45 = vadd.f32 1.0, %v1223_v43 }
 0x690   : > { %v888_v46 = vmul.f32 %v887_v45, %v880_v44 }
 0x692   : > { %v889_v47 = vpack.c.bf16 %v888_v46, %v888_v46 }
 0x694   : > { %966 = vmatmul.bf16.vlgmr.msrb.gmra.mxu3 %v889_v47 }
 0x717   : > { %v967_v49 = vpop.f32.mrf.mxu3 }
 0x718   : > { %v968_v50 = vadd.f32 %v1201_v48, %v967_v49 }
 0x71a   : > { %v971_v51 = vmul.f32 %v968_v50, %v806_v59 }
 0x71c   : > { %v972_v52 = vadd.f32 %v971_v51, %v1528_v62 }
 0x71e   : > { %973 = vst.msk [vmem:[%s440_s23] sm:$0xff] %vm450_vm0, %v972_v52 }
 0x71f   : > { %v969_v53 = vpop.f32.mrf.mxu3 }
 0x720   : > { %1263 = shalt.err (!%p1260_p3)
}
 0x721   : > { %1140 = dma.vmem_to_hbm [thread:$0]  (%p1433_p5), %s988_s24, 128, %s990_s4, %s975_s0  }
 0x722 PF: > { %p1146_p4 = scmp.ge.s32.totalorder %s1300_s20, 2  ;;  %s1001_s1 = sand.u32 1, %s1288_s17  }
 0x723   : > { %s1002_s21 = scalar_lea.sflag [#allocation5], %s1001_s1 }
 0x724   : > { %p1143_p7 = pnand %p1146_p4, %p1437_p6 }
 0x726   : > { %p1144_p8 = pneg %p1143_p7 }
 0x728   : > { %1283 = dma.done.wait (%p1144_p8), %s1002_s21, 128  }
 0x729   : > { %1285 = vsyncadd (%p1144_p8), %s1002_s21, 4294967168  ;;  %p32_p9 = scmp.ge.s32.totalorder %s1420_s22, 4   ;;  %s1640_s17 = smov %s1292_s18 }
 0x72a   : > { %s1641_s18 = smov %s1296_s19  ;;  %s1642_s19 = smov %s1431_s25 }
 0x72b   : > { %s1643_s20 = smov %s1420_s22  ;;  %34 = sbr.rel (!%p32_p9) target bundleno = 12 (0xc), region = 107 }
 0x730   :  { %1008 = vsyncpa [#allocation5], 1 }
 0x731   :  { %1010 = vsyncpa [#allocation5 + $0x1], 1 }

</bundles_post_ra>
